<compile_context>
chip_gen: v6e
topology: v6e:2x2x1
jax: 0.10.0
libtpu: 0.0.40
codegen_flags: <defaults>
</compile_context>

<pallas_src>
import functools

import jax
import jax.numpy as jnp
from jax import lax
from jax.experimental import pallas as pl
from jax.experimental.pallas import tpu as pltpu


def _round_up(x, m):
    return ((x + m - 1) // m) * m


def modular_gn_kernel(sp_ref, x_ref, w_ref, b_ref, o_ref, *, activation, act_in_bf16):
    # sp_ref: SMEM (1,) f32  -- softplus(beta), precomputed in the wrapper
    # x_ref:  VMEM (TB, in_dim) f32        -- batch tile
    # w_ref:  VMEM (embed_dim, in_dim) bf16 -- resident across grid steps (cast hoisted)
    # b_ref:  VMEM (1, embed_dim) f32       -- resident across grid steps
    # o_ref:  VMEM (TB, in_dim) f32
    sp = sp_ref[0]

    x_bf = x_ref[...].astype(jnp.bfloat16)
    w_bf = w_ref[...]  # already bf16 (no per-step cast)

    # z = x @ W.T + b  (contract in_dim of x with in_dim of W; no transpose materialized)
    z = lax.dot_general(
        x_bf, w_bf,
        dimension_numbers=(((1,), (1,)), ((), ())),
        preferred_element_type=jnp.float32,
    ) + b_ref[...]

    # Elementwise activation; sp is a scalar so the scale fuses into the act arg.
    # NOTE: for a non-full final batch tile the padded rows also go through the
    # activation and matmul; the values are finite (bounded act, finite W) and the
    # output writeback masking discards them, so this is safe.
    if act_in_bf16:
        a_bf = activation((z * sp).astype(jnp.bfloat16)).astype(jnp.bfloat16)
    else:
        a_bf = activation(z * sp).astype(jnp.bfloat16)

    # out = a @ W   (F.linear(a, weight=W.T) == a @ W)
    out = jnp.dot(a_bf, w_bf, preferred_element_type=jnp.float32)
    o_ref[...] = out.astype(o_ref.dtype)


def modular_gn(x, W, b, beta, *, tb=1024, activation=jnp.tanh):
    """x: (B, in_dim) f32; W: (embed_dim, in_dim); b: (embed_dim,); beta: (1,)."""
    B, in_dim = x.shape
    embed_dim = W.shape[0]

    kind = jax.devices()[0].device_kind.lower()
    multi_tc = "v7" in kind            # v7x: 2 TensorCores per chip
    act_in_bf16 = "v5" not in kind     # v5e has no bf16 VPU/EUP

    # ---- batch tile selection ----
    # Big TB amortizes the ~0.35us/step pipeline overhead (tiles here are tiny).
    # On v7x make sure the grid has >= 2 steps so the "parallel" axis shards
    # across both TensorCores instead of leaving one idle.
    if multi_tc and B > 8:
        TB = min(tb, _round_up(pl.cdiv(B, 2), 8))
    else:
        TB = min(tb, B)
    if TB < B:
        TB = _round_up(TB, 8)          # (8,128) sublane constraint when tiling
    grid = (pl.cdiv(B, TB),)

    # One-time parameter prep (tiny ops): bf16 weights, 2D bias, scalar softplus.
    W_bf = W.astype(jnp.bfloat16)
    b2d = b.astype(jnp.float32).reshape(1, embed_dim)
    sp = jnp.logaddexp(jnp.float32(0.0), beta.astype(jnp.float32))  # softplus(beta), shape (1,)

    # ---- explicit VMEM accounting (BlockSpec inputs are double-buffered even
    # with a constant index_map) ----
    vmem_bytes = (
        2 * TB * in_dim * 4            # x tiles (f32, double-buffered)
        + 2 * TB * in_dim * 4          # out tiles (f32, double-buffered)
        + 2 * embed_dim * in_dim * 2   # W (bf16, double-buffered)
        + 2 * embed_dim * 4            # b
        + 2 * TB * embed_dim * 4       # z / activation intermediates (f32)
        + TB * in_dim * 4              # second matmul f32 result before cast
    )
    vmem_limit = int(min(max(2 * vmem_bytes, 16 << 20), 64 << 20))

    cost = pl.CostEstimate(
        flops=2 * 2 * B * in_dim * embed_dim,                       # two matmuls
        transcendentals=B * embed_dim,                              # activation
        bytes_accessed=(2 * B * in_dim * 4 + W_bf.size * 2 + b.size * 4),
    )

    kernel = functools.partial(
        modular_gn_kernel, activation=activation, act_in_bf16=act_in_bf16
    )

    return pl.pallas_call(
        kernel,
        out_shape=jax.ShapeDtypeStruct((B, in_dim), x.dtype),
        grid_spec=pltpu.PrefetchScalarGridSpec(
            num_scalar_prefetch=0,
            grid=grid,
            in_specs=[
                pl.BlockSpec(memory_space=pltpu.MemorySpace.SMEM),    # sp (scalar)
                pl.BlockSpec((TB, in_dim), lambda i: (i, 0)),         # x tile
                pl.BlockSpec((embed_dim, in_dim), lambda i: (0, 0)),  # W bf16 (resident)
                pl.BlockSpec((1, embed_dim), lambda i: (0, 0)),       # b (resident)
            ],
            out_specs=pl.BlockSpec((TB, in_dim), lambda i: (i, 0)),
        ),
        compiler_params=pltpu.CompilerParams(
            dimension_semantics=("parallel",),                        # independent batch tiles
            vmem_limit_bytes=vmem_limit,
        ),
        cost_estimate=cost,
    )(sp, x, W_bf, b2d)


def reference(x, W, b, beta, activation=jnp.tanh):
    sp = jnp.logaddexp(0.0, beta[0])
    z = x @ W.T + b
    a = activation(z * sp)
    return a @ W


if __name__ == "__main__":
    key = jax.random.PRNGKey(0)
    k_x, k_w, k_b, k_beta = jax.random.split(key, 4)

    # Small but tiling-exercising shapes: >= 2 grid steps with tb=128.
    B, in_dim, embed_dim = 256, 32, 64

    # Deterministic parameter init mirroring the PyTorch module:
    #   W, b ~ U(-k, k) with k = sqrt(1/in_dim); beta ~ U(0, 1)
    k = jnp.sqrt(1.0 / in_dim)
    W = jax.random.uniform(k_w, (embed_dim, in_dim), jnp.float32, -k, k)
    b = jax.random.uniform(k_b, (embed_dim,), jnp.float32, -k, k)
    beta = jax.random.uniform(k_beta, (1,), jnp.float32, 0.0, 1.0)

    x = jax.random.normal(k_x, (B, in_dim), jnp.float32)

    out = modular_gn(x, W, b, beta, tb=128, activation=jnp.tanh)
    out = jax.block_until_ready(out)

    ref = reference(x, W, b, beta)
    assert out.shape == (B, in_dim)
    # Tolerance relaxed on purpose: bf16 MXU operands with f32 accumulation.
    assert jnp.allclose(out, ref, atol=5e-2, rtol=5e-2), float(jnp.abs(out - ref).max())

    print("KERNEL_OK")
</pallas_src>

<mosaic_0001>
module attributes {stable_mosaic.version = 11 : i64} {
  func.func @modular_gn_kernel(%arg0: i32, %arg1: memref<1xf32, #tpu.memory_space<smem>>, %arg2: memref<128x32xf32, #tpu.memory_space<vmem>>, %arg3: memref<64x32xbf16, #tpu.memory_space<vmem>>, %arg4: memref<1x64xf32, #tpu.memory_space<vmem>>, %arg5: memref<128x32xf32, #tpu.memory_space<vmem>>) attributes {dimension_semantics = [#tpu.dimension_semantics<parallel>], iteration_bounds = array<i64: 2>, scalar_prefetch = 0 : i64, scratch_operands = 0 : i64, tpu.core_type = #tpu.core_type<tc>, window_params = [{transform_indices = @transform_0, window_bounds = array<i64: 1>}, {transform_indices = @transform_1, window_bounds = array<i64: 128, 32>}, {pipeline_mode = #tpu.pipeline_mode<synchronous>, transform_indices = @transform_2, window_bounds = array<i64: 64, 32>}, {pipeline_mode = #tpu.pipeline_mode<synchronous>, transform_indices = @transform_3, window_bounds = array<i64: 1, 64>}, {transform_indices = @transform_4, window_bounds = array<i64: 128, 32>}]} {
    %c0 = arith.constant 0 : index
    %0 = memref.load %arg1[%c0] : memref<1xf32, #tpu.memory_space<smem>>
    %c0_0 = arith.constant 0 : index
    %c0_1 = arith.constant 0 : index
    %1 = vector.load %arg2[%c0_0, %c0_1] : memref<128x32xf32, #tpu.memory_space<vmem>>, vector<128x32xf32>
    %2 = arith.truncf %1 : vector<128x32xf32> to vector<128x32xbf16>
    %c0_2 = arith.constant 0 : index
    %c0_3 = arith.constant 0 : index
    %3 = vector.load %arg3[%c0_2, %c0_3] : memref<64x32xbf16, #tpu.memory_space<vmem>>, vector<64x32xbf16>
    %cst = arith.constant dense<0.000000e+00> : vector<128x64xf32>
    %4 = tpu.matmul %2, %3, %cst {dimension_numbers = #tpu.dot_dimension_numbers<[1], [1], [0], [0], [0, 0, 1, 0], [], []>} : vector<128x32xbf16>, vector<64x32xbf16>, vector<128x64xf32> -> vector<128x64xf32>
    %c0_4 = arith.constant 0 : index
    %c0_5 = arith.constant 0 : index
    %5 = vector.load %arg4[%c0_4, %c0_5] : memref<1x64xf32, #tpu.memory_space<vmem>>, vector<1x64xf32>
    %6 = vector.broadcast %5 : vector<1x64xf32> to vector<128x64xf32>
    %7 = arith.addf %4, %6 : vector<128x64xf32>
    %8 = vector.broadcast %0 : f32 to vector<128x64xf32>
    %9 = arith.mulf %7, %8 : vector<128x64xf32>
    %10 = arith.truncf %9 : vector<128x64xf32> to vector<128x64xbf16>
    %11 = math.tanh %10 : vector<128x64xbf16>
    %cst_6 = arith.constant dense<0.000000e+00> : vector<128x32xf32>
    %12 = tpu.matmul %11, %3, %cst_6 {dimension_numbers = #tpu.dot_dimension_numbers<[1], [0], [0], [1], [0, 0, 1, 1], [], []>} : vector<128x64xbf16>, vector<64x32xbf16>, vector<128x32xf32> -> vector<128x32xf32>
    %c0_7 = arith.constant 0 : index
    %c0_8 = arith.constant 0 : index
    %13 = vector.load %arg5[%c0_7, %c0_8] : memref<128x32xf32, #tpu.memory_space<vmem>>, vector<128x32xf32>
    tpu.vector_store %arg5[%c0_7, %c0_8], %12 {strides = array<i32>} : memref<128x32xf32, #tpu.memory_space<vmem>>, vector<128x32xf32>,
    return
  }
  func.func @transform_0(%arg0: i32) -> i32 {
    %c0_i32 = arith.constant 0 : i32
    %c0_i32_0 = arith.constant 0 : i32
    return %c0_i32 : i32
  }
  func.func @transform_1(%arg0: i32) -> (i32, i32) {
    %c0_i32 = arith.constant 0 : i32
    %c0_i32_0 = arith.constant 0 : i32
    return %arg0, %c0_i32 : i32, i32
  }
  func.func @transform_2(%arg0: i32) -> (i32, i32) {
    %c0_i32 = arith.constant 0 : i32
    %c0_i32_0 = arith.constant 0 : i32
    %c0_i32_1 = arith.constant 0 : i32
    return %c0_i32, %c0_i32_0 : i32, i32
  }
  func.func @transform_3(%arg0: i32) -> (i32, i32) {
    %c0_i32 = arith.constant 0 : i32
    %c0_i32_0 = arith.constant 0 : i32
    %c0_i32_1 = arith.constant 0 : i32
    return %c0_i32, %c0_i32_0 : i32, i32
  }
  func.func @transform_4(%arg0: i32) -> (i32, i32) {
    %c0_i32 = arith.constant 0 : i32
    %c0_i32_0 = arith.constant 0 : i32
    return %arg0, %c0_i32 : i32, i32
  }
}

</mosaic_0001>

<bundles_post_ra>
// kernel: tpu_custom_call.1
= control target key start
LH: loop header
LB: loop body
LE: loop exit
PB: predicated region body
PF: predicated region fallthrough
CT: control target
= control target key end

     0   :  { %s800_s17 = smov 0   ;;  %s915_s0 = inlined_call_operand.<no memory space> [shape: f32[1], index: 0, kind: input, shape index: {}]   ;;  %s916_s1 = inlined_call_operand.vmem [shape: f32[256,32], index: 1, kind: input, shape index: {}]   ;;  %s917_s2 = inlined_call_operand.vmem [shape: bf16[64,32], index: 2, kind: input, shape index: {}]   ;;  %s918_s3 = inlined_call_operand.vmem [shape: f32[1,64], index: 3, kind: input, shape index: {}]   ;;  %s919_s4 = inlined_call_operand.vmem [shape: f32[256,32], index: 4, kind: output, shape index: {}]  }
   0x1   :  { %9 = sst [smem:[#allocation2]] %s915_s0 }
   0x2 LB: > { %s628_s18 = sadd.s32 4294967295, %s770_s17   ;;  %p632_p0 = scmp.ge.s32.totalorder %s770_s17, 1  ;;  %s770_s17 = sphi %s800_s17, %s15_s17  }
   0x3   : > { %p164_p1 = scmp.lt.s32.totalorder %s770_s17, 3 }
   0x5   : > { %p165_p2 = pnand %p632_p0, %p164_p1 }
   0x6   : > { %s633_s22 = sshll.u32 (!%p165_p2), %s628_s18, 4  ;;  %s203_s5 = sld [smem:[#allocation2]] (!%p165_p2) }
   0x7   : > { %168 = sbr.rel (%p165_p2) target bundleno = 490 (0x1ea), region = 36  ;;  %p191_p3 = scmp.lt.s32.totalorder (!%p165_p2), %s633_s22, 31 }
   0xc   : > { %v744_v0 = vld [vmem:[%s917_s2 + $0x18] sm:$0xff]   ;;  %vm263_vm0 = vcmask 261120   ;;  %v745_v1 = vld [vmem:[%s917_s2 + $0x10] sm:$0xff]   ;;  %v746_v3 = vld [vmem:[%s917_s2 + $0x8] sm:$0xff]   ;;  %s921_s22 = smov (!%p191_p3, %s633_s22), 31  ;;  %v397_v37 = vstv %s203_s5  ;;  %vm434_vm1 = vcmask 523264  }
   0xd   : > { %732 = vmatprep.subr.msk.bf16.mxu0 %vm263_vm0, %v744_v0  ;;  %v298_v2 = vsel %vm263_vm0, %v744_v0, 0  ;;  %708 = vmatprep.subr.bf16.mxu1 %v744_v0  ;;  %v295_v4 = vsel %vm263_vm0, %v745_v1, 0  ;;  %s634_s25 = sshll.u32 %s921_s22, 3  ;;  %v747_v5 = vld [vmem:[%s917_s2] sm:$0xff]   ;;  %v292_v9 = vsel %vm263_vm0, %v746_v3, 0 }
   0xe   : > { %685 = vmatpush3.bf16.xpose.msra.mxu0 %v298_v2  ;;  %709 = vmatpush3.bf16.msra.mxu1 %v744_v0  ;;  %s829_s28 = scalar_lea.vmem %s916_s1, %s634_s25  ;;  %v289_v10 = vsel %vm263_vm0, %v747_v5, 0  ;;  %v637_v33 = vld [vmem:[%s918_s3] ss:$0 sm:$0xff]  ;;  %s878_s10 = scalar_lea.vmem %s919_s4, %s634_s25 }
   0xf   : > { %733 = vmatprep.subr.msk.bf16.mxu0 %vm263_vm0, %v745_v1  ;;  %710 = vmatprep.subr.bf16.mxu1 %v745_v1  ;;  %v204_v6 = vld [vmem:[%s829_s28] sm:$0xff]  ;;  %v205_v7 = vld [vmem:[%s829_s28 + $0x8] sm:$0xff]  ;;  %v206_v11 = vld [vmem:[%s829_s28 + $0x10] sm:$0xff] }
  0x10   : > { %v220_v8 = vpack.c.bf16 %v205_v7, %v204_v6  ;;  %v207_v12 = vld [vmem:[%s829_s28 + $0x18] sm:$0xff]  ;;  %v208_v13 = vld [vmem:[%s829_s28 + $0x20] sm:$0xff]  ;;  %v209_v14 = vld [vmem:[%s829_s28 + $0x28] sm:$0xff] }
  0x11   : > { %v221_v15 = vpack.c.bf16 %v207_v12, %v206_v11  ;;  %v222_v16 = vpack.c.bf16 %v209_v14, %v208_v13  ;;  %v210_v17 = vld [vmem:[%s829_s28 + $0x30] sm:$0xff]  ;;  %v211_v18 = vld [vmem:[%s829_s28 + $0x38] sm:$0xff]  ;;  %v212_v19 = vld [vmem:[%s829_s28 + $0x40] sm:$0xff] }
  0x12   : > { %711 = vmatpush3.bf16.msra.mxu1 %v745_v1  ;;  %692 = vmatprep.mubr.msk.bf16.mxu0 %vm263_vm0, %v220_v8  ;;  %v213_v20 = vld [vmem:[%s829_s28 + $0x48] sm:$0xff]  ;;  %v223_v21 = vpack.c.bf16 %v211_v18, %v210_v17  ;;  %v214_v23 = vld [vmem:[%s829_s28 + $0x50] sm:$0xff]  ;;  %v215_v24 = vld [vmem:[%s829_s28 + $0x58] sm:$0xff] }
  0x13   : > { %712 = vmatprep.subr.bf16.mxu1 %v746_v3  ;;  %v224_v22 = vpack.c.bf16 %v213_v20, %v212_v19  ;;  %v216_v25 = vld [vmem:[%s829_s28 + $0x60] sm:$0xff]  ;;  %v217_v26 = vld [vmem:[%s829_s28 + $0x68] sm:$0xff]  ;;  %v225_v27 = vpack.c.bf16 %v215_v24, %v214_v23  ;;  %v218_v29 = vld [vmem:[%s829_s28 + $0x70] sm:$0xff] }
  0x14   : > { %v226_v28 = vpack.c.bf16 %v217_v26, %v216_v25  ;;  %v219_v30 = vld [vmem:[%s829_s28 + $0x78] sm:$0xff] }
  0x15   : > { %v227_v31 = vpack.c.bf16 %v219_v30, %v218_v29 }
  0x16   : > { %687 = vmatpush3.bf16.xpose.msra.mxu0 %v295_v4  ;;  %713 = vmatpush3.bf16.msra.mxu1 %v746_v3 }
  0x17   : > { %734 = vmatprep.subr.msk.bf16.mxu0 %vm263_vm0, %v746_v3  ;;  %714 = vmatprep.subr.bf16.mxu1 %v747_v5 }
  0x1a   : > { %715 = vmatpush3.bf16.msra.mxu1 %v747_v5 }
  0x1e   : > { %689 = vmatpush3.bf16.xpose.msra.mxu0 %v292_v9 }
  0x1f   : > { %735 = vmatprep.subr.msk.bf16.mxu0 %vm263_vm0, %v747_v5 }
  0x26   : > { %691 = vmatpush3.bf16.xpose.msra.mxu0 %v289_v10 }
  0x2d   : > { %693 = vmatmul.mubr.msk.bf16.vlgmr.msra.gmra.mxu0 %vm263_vm0, %v221_v15 }
  0x2e   : > { %696 = vmatprep.mubr.msk.bf16.mxu0 %vm263_vm0, %v222_v16 }
  0x35   : > { %697 = vmatmul.mubr.msk.bf16.gmra.mxu0 %vm263_vm0, %v223_v21 }
  0x36   : > { %700 = vmatprep.mubr.msk.bf16.mxu0 %vm263_vm0, %v224_v22 }
  0x3d   : > { %701 = vmatmul.mubr.msk.bf16.gmra.mxu0 %vm263_vm0, %v225_v27 }
  0x3e   : > { %704 = vmatprep.mubr.msk.bf16.mxu0 %vm263_vm0, %v226_v28 }
  0x45   : > { %705 = vmatmul.mubr.msk.bf16.gmra.mxu0 %vm263_vm0, %v227_v31 }
  0xed   : > { %v694_v32 = vpop.f32.mrf.mxu0 }
  0xee   : > { %v343_v35 = vadd.f32 %v694_v32, %v637_v33 }
  0xef   : > { %v334_v34 = vpop.f32.mrf.mxu0 }
  0xf0   : > { %v335_v38 = vadd.f32 %v637_v33, %v334_v34  ;;  %v400_v43 = vmul.f32 %v397_v37, %v343_v35 }
  0xf1   : > { %v695_v36 = vpop.f32.mrf.mxu0 }
  0xf2   : > { %v346_v39 = vadd.f32 %v695_v36, %v637_v33  ;;  %v398_v45 = vmul.f32 %v397_v37, %v335_v38 }
  0xf3   : > { %v337_v40 = vpop.f32.mrf.mxu0 }
  0xf4   : > { %v401_v41 = vmul.f32 %v397_v37, %v346_v39  ;;  %v338_v42 = vadd.f32 %v637_v33, %v337_v40 }
  0xf5   : > { %v698_v44 = vpop.f32.mrf.mxu0 }
  0xf6   : > { %v399_v46 = vmul.f32 %v397_v37, %v338_v42  ;;  %v415_v47 = vpack.c.bf16 %v401_v41, %v400_v43  ;;  %v359_v50 = vadd.f32 %v698_v44, %v637_v33 }
  0xf7   : > { %v350_v48 = vpop.f32.mrf.mxu0 }
  0xf8   : > { %v414_v49 = vpack.c.bf16 %v399_v46, %v398_v45  ;;  %v351_v52 = vadd.f32 %v637_v33, %v350_v48  ;;  %v404_v57 = vmul.f32 %v397_v37, %v359_v50 }
  0xf9   : > { %v699_v51 = vpop.f32.mrf.mxu0 }
  0xfa   : > { %748 = vtanh.bf16 %v414_v49  ;;  %v362_v53 = vadd.f32 %v699_v51, %v637_v33  ;;  %v402_v59 = vmul.f32 %v397_v37, %v351_v52 }
  0xfb   : > { %750 = vtanh.bf16 %v415_v47  ;;  %v353_v54 = vpop.f32.mrf.mxu0 }
  0xfc   : > { %v405_v55 = vmul.f32 %v397_v37, %v362_v53  ;;  %v354_v56 = vadd.f32 %v637_v33, %v353_v54 }
  0xfd   : > { %v702_v58 = vpop.f32.mrf.mxu0 }
  0xfe   : > { %v403_v60 = vmul.f32 %v397_v37, %v354_v56  ;;  %v417_v61 = vpack.c.bf16 %v405_v55, %v404_v57  ;;  %v375_v0 = vadd.f32 %v702_v58, %v637_v33 }
  0xff   : > { %v366_v62 = vpop.f32.mrf.mxu0 }
 0x100   : > { %v416_v63 = vpack.c.bf16 %v403_v60, %v402_v59  ;;  %v367_v2 = vadd.f32 %v637_v33, %v366_v62  ;;  %v408_v7 = vmul.f32 %v397_v37, %v375_v0 }
 0x101   : > { %v703_v1 = vpop.f32.mrf.mxu0 }
 0x102   : > { %752 = vtanh.bf16 %v416_v63  ;;  %v378_v3 = vadd.f32 %v703_v1, %v637_v33  ;;  %v406_v9 = vmul.f32 %v397_v37, %v367_v2 }
 0x103   : > { %754 = vtanh.bf16 %v417_v61  ;;  %v369_v4 = vpop.f32.mrf.mxu0 }
 0x104   : > { %v409_v5 = vmul.f32 %v397_v37, %v378_v3  ;;  %v370_v6 = vadd.f32 %v637_v33, %v369_v4 }
 0x105   : > { %v706_v8 = vpop.f32.mrf.mxu0 }
 0x106   : > { %v407_v10 = vmul.f32 %v397_v37, %v370_v6  ;;  %v419_v11 = vpack.c.bf16 %v409_v5, %v408_v7  ;;  %v391_v16 = vadd.f32 %v706_v8, %v637_v33 }
 0x107   : > { %v382_v12 = vpop.f32.mrf.mxu0 }
 0x108   : > { %v749_v13 = vpop.eup %748  ;;  %v418_v14 = vpack.c.bf16 %v407_v10, %v406_v9  ;;  %v383_v18 = vadd.f32 %v637_v33, %v382_v12  ;;  %v412_v23 = vmul.f32 %v397_v37, %v391_v16 }
 0x109   : > { %v751_v15 = vpop.eup %750  ;;  %v707_v17 = vpop.f32.mrf.mxu0  ;;  %716 = vmatprep.mubr.msk.bf16.mxu1 %vm434_vm1, %v749_v13 }
 0x10a   : > { %756 = vtanh.bf16 %v418_v14  ;;  %v394_v19 = vadd.f32 %v707_v17, %v637_v33  ;;  %717 = vmatmul.mubr.msk.bf16.vlgmr.msra.gmra.mxu1 %vm434_vm1, %v751_v15  ;;  %v410_v24 = vmul.f32 %v397_v37, %v383_v18 }
 0x10b   : > { %758 = vtanh.bf16 %v419_v11  ;;  %v385_v20 = vpop.f32.mrf.mxu0 }
 0x10c   : > { %v413_v21 = vmul.f32 %v397_v37, %v394_v19  ;;  %v386_v22 = vadd.f32 %v637_v33, %v385_v20 }
 0x10e   : > { %v411_v25 = vmul.f32 %v397_v37, %v386_v22  ;;  %v421_v26 = vpack.c.bf16 %v413_v21, %v412_v23 }
 0x110   : > { %v753_v27 = vpop.eup %752  ;;  %v420_v28 = vpack.c.bf16 %v411_v25, %v410_v24 }
 0x111   : > { %v755_v29 = vpop.eup %754  ;;  %720 = vmatprep.mubr.msk.bf16.mxu1 %vm434_vm1, %v753_v27 }
 0x112   : > { %760 = vtanh.bf16 %v420_v28  ;;  %721 = vmatmul.mubr.msk.bf16.gmra.mxu1 %vm434_vm1, %v755_v29 }
 0x113   : > { %762 = vtanh.bf16 %v421_v26 }
 0x118   : > { %v757_v30 = vpop.eup %756 }
 0x119   : > { %v759_v31 = vpop.eup %758  ;;  %724 = vmatprep.mubr.msk.bf16.mxu1 %vm434_vm1, %v757_v30 }
 0x11a   : > { %725 = vmatmul.mubr.msk.bf16.gmra.mxu1 %vm434_vm1, %v759_v31 }
 0x120   : > { %v761_v32 = vpop.eup %760 }
 0x121   : > { %v763_v33 = vpop.eup %762  ;;  %728 = vmatprep.mubr.msk.bf16.mxu1 %vm434_vm1, %v761_v32 }
 0x122   : > { %729 = vmatmul.mubr.msk.bf16.gmra.mxu1 %vm434_vm1, %v763_v33 }
 0x1ca   : > { %v718_v34 = vpop.f32.mrf.mxu1 }
 0x1cb   : > { %558 = vst.msk [vmem:[%s878_s10 + $0x10] sm:$0xff] %vm263_vm0, %v718_v34 }
 0x1cc   : > { %v493_v35 = vpop.f32.mrf.mxu1 }
 0x1cd   : > { %556 = vst.msk [vmem:[%s878_s10] sm:$0xff] %vm263_vm0, %v493_v35 }
 0x1ce   : > { %v719_v36 = vpop.f32.mrf.mxu1 }
 0x1cf   : > { %559 = vst.msk [vmem:[%s878_s10 + $0x18] sm:$0xff] %vm263_vm0, %v719_v36 }
 0x1d0   : > { %v496_v37 = vpop.f32.mrf.mxu1 }
 0x1d1   : > { %557 = vst.msk [vmem:[%s878_s10 + $0x8] sm:$0xff] %vm263_vm0, %v496_v37 }
 0x1d2   : > { %v722_v38 = vpop.f32.mrf.mxu1 }
 0x1d3   : > { %562 = vst.msk [vmem:[%s878_s10 + $0x30] sm:$0xff] %vm263_vm0, %v722_v38 }
 0x1d4   : > { %v509_v39 = vpop.f32.mrf.mxu1 }
 0x1d5   : > { %560 = vst.msk [vmem:[%s878_s10 + $0x20] sm:$0xff] %vm263_vm0, %v509_v39 }
 0x1d6   : > { %v723_v40 = vpop.f32.mrf.mxu1 }
 0x1d7   : > { %563 = vst.msk [vmem:[%s878_s10 + $0x38] sm:$0xff] %vm263_vm0, %v723_v40 }
 0x1d8   : > { %v512_v41 = vpop.f32.mrf.mxu1 }
 0x1d9   : > { %561 = vst.msk [vmem:[%s878_s10 + $0x28] sm:$0xff] %vm263_vm0, %v512_v41 }
 0x1da   : > { %v726_v42 = vpop.f32.mrf.mxu1 }
 0x1db   : > { %566 = vst.msk [vmem:[%s878_s10 + $0x50] sm:$0xff] %vm263_vm0, %v726_v42 }
 0x1dc   : > { %v525_v43 = vpop.f32.mrf.mxu1 }
 0x1dd   : > { %564 = vst.msk [vmem:[%s878_s10 + $0x40] sm:$0xff] %vm263_vm0, %v525_v43 }
 0x1de   : > { %v727_v44 = vpop.f32.mrf.mxu1 }
 0x1df   : > { %567 = vst.msk [vmem:[%s878_s10 + $0x58] sm:$0xff] %vm263_vm0, %v727_v44 }
 0x1e0   : > { %v528_v45 = vpop.f32.mrf.mxu1 }
 0x1e1   : > { %565 = vst.msk [vmem:[%s878_s10 + $0x48] sm:$0xff] %vm263_vm0, %v528_v45 }
 0x1e2   : > { %v730_v46 = vpop.f32.mrf.mxu1 }
 0x1e3   : > { %570 = vst.msk [vmem:[%s878_s10 + $0x70] sm:$0xff] %vm263_vm0, %v730_v46 }
 0x1e4   : > { %v541_v47 = vpop.f32.mrf.mxu1 }
 0x1e5   : > { %568 = vst.msk [vmem:[%s878_s10 + $0x60] sm:$0xff] %vm263_vm0, %v541_v47 }
 0x1e6   : > { %v731_v48 = vpop.f32.mrf.mxu1 }
 0x1e7   : > { %571 = vst.msk [vmem:[%s878_s10 + $0x78] sm:$0xff] %vm263_vm0, %v731_v48 }
 0x1e8   : > { %v544_v49 = vpop.f32.mrf.mxu1 }
 0x1e9   : > { %569 = vst.msk [vmem:[%s878_s10 + $0x68] sm:$0xff] %vm263_vm0, %v544_v49 }
 0x1ea PF: > { %s15_s17 = sadd.s32 1, %s770_s17  }
 0x1eb   : > { %p12_p4 = scmp.ge.s32.totalorder %s15_s17, 4  }
 0x1ed   :  { %14 = sbr.rel (!%p12_p4) target bundleno = 2 (0x2), region = 66 }

</bundles_post_ra>
